<compile_context>
chip_gen: v6e
topology: v6e:2x2x1
jax: 0.10.0
libtpu: 0.0.40
codegen_flags: <defaults>
</compile_context>

<pallas_src>
import functools

import jax
import jax.numpy as jnp
from jax import lax
from jax.experimental import pallas as pl
from jax.experimental.pallas import tpu as pltpu


_VMEM_LIMIT = 32 * 1024 * 1024   # safe on v5e (128 MiB phys), v6e (128), v7x (64)
_MAX_HW_TILE = 2048              # lane-dim tile cap; keeps blocks well under VMEM


def _pick_hw_tile(hw, max_tile=_MAX_HW_TILE):
    """Largest multiple of 128 that divides hw (capped), else the full extent."""
    if hw % 128 != 0:
        # TODO(synk): hw not a multiple of 128 falls back to one full-width block;
        # masked partial tiles would be needed to tile a ragged hw.
        return hw
    best = 128
    cand = 128
    while cand <= min(hw, max_tile):
        if hw % cand == 0:
            best = cand
        cand += 128
    return best


# ---------------------------------------------------------------------------
# Pass 1: per-group statistics  sum(x), sum(x xT)  ->  Sigma, mean
# ---------------------------------------------------------------------------
def _stats_kernel(x_ref, sigma_ref, mean_ref, xx_acc, xs_acc, *,
                  eps, m_total, mxu_bf16):
    # x_ref: (1, d, t) slab of the (N, C, H*W) input for one (group, sample,
    # hw-tile).  Grid = (g, N, hw_tiles); inner two axes are the reduction.
    n_i = pl.program_id(1)
    t_i = pl.program_id(2)
    is_first = jnp.logical_and(n_i == 0, t_i == 0)
    is_last = jnp.logical_and(n_i == pl.num_programs(1) - 1,
                              t_i == pl.num_programs(2) - 1)

    @pl.when(is_first)
    def _():
        xx_acc[...] = jnp.zeros_like(xx_acc)
        xs_acc[...] = jnp.zeros_like(xs_acc)

    x = x_ref[0]                                        # (d, t), original dtype
    xf = x.astype(jnp.float32)
    xs_acc[...] += jnp.sum(xf, axis=1, keepdims=True)   # (d, 1) f32
    # Covariance accumulation: contract over the sample axis of BOTH operands
    # (no xc.T materialized).  Operands optionally bf16, accumulation in f32.
    xm = x.astype(jnp.bfloat16) if mxu_bf16 else xf
    xx_acc[...] += lax.dot_general(
        xm, xm, dimension_numbers=(((1,), (1,)), ((), ())),
        preferred_element_type=jnp.float32)

    @pl.when(is_last)
    def _():
        d = xx_acc.shape[0]
        inv_m = jnp.float32(1.0 / m_total)
        row = lax.broadcasted_iota(jnp.int32, (d, d), 0)
        col = lax.broadcasted_iota(jnp.int32, (d, d), 1)
        eye = (row == col).astype(jnp.float32)
        mean_col = xs_acc[...] * inv_m                   # (d, 1)
        # Lane-dense (1, d) copy of the mean without an in-kernel transpose:
        # sum diag(mean) over its sublane axis.
        mean_row = jnp.sum(eye * mean_col, axis=0, keepdims=True)   # (1, d)
        # Sigma = E[x xT] - mu muT + eps * I     (all f32)
        sigma = (xx_acc[...] * inv_m - mean_col * mean_row
                 + jnp.float32(eps) * eye)
        sigma_ref[0] = sigma
        mean_ref[0] = mean_row


def _compute_group_stats(x3, g, d, eps, mxu_bf16):
    """x3: (N, C, H*W).  Returns (sigma (g,d,d) f32, mean (g,1,d) f32)."""
    N, C, HW = x3.shape
    t = _pick_hw_tile(HW)
    nt = HW // t
    m_total = N * HW
    kernel = functools.partial(_stats_kernel, eps=eps, m_total=m_total,
                               mxu_bf16=mxu_bf16)
    return pl.pallas_call(
        kernel,
        out_shape=(jax.ShapeDtypeStruct((g, d, d), jnp.float32),
                   jax.ShapeDtypeStruct((g, 1, d), jnp.float32)),
        grid_spec=pltpu.PrefetchScalarGridSpec(
            num_scalar_prefetch=0,
            grid=(g, N, nt),
            in_specs=[pl.BlockSpec((1, d, t), lambda gi, n, ti: (n, gi, ti))],
            out_specs=(pl.BlockSpec((1, d, d), lambda gi, n, ti: (gi, 0, 0)),
                       pl.BlockSpec((1, 1, d), lambda gi, n, ti: (gi, 0, 0))),
            scratch_shapes=[pltpu.VMEM((d, d), jnp.float32),
                            pltpu.VMEM((d, 1), jnp.float32)]),
        compiler_params=pltpu.CompilerParams(
            dimension_semantics=("parallel", "arbitrary", "arbitrary"),
            vmem_limit_bytes=_VMEM_LIMIT),
    )(x3)


# ---------------------------------------------------------------------------
# Pass 2: batched Newton-Schulz iterations (all groups at once, f32)
# ---------------------------------------------------------------------------
def _newton_kernel(sigma_ref, wm_ref, *, T):
    sigma = sigma_ref[...]                               # (g, d, d) f32
    g, d, _ = sigma.shape
    row = lax.broadcasted_iota(jnp.int32, (g, d, d), 1)
    col = lax.broadcasted_iota(jnp.int32, (g, d, d), 2)
    eye = (row == col).astype(jnp.float32)
    trace = jnp.sum(jnp.sum(sigma * eye, axis=2, keepdims=True),
                    axis=1, keepdims=True)               # (g, 1, 1)
    r_tr = 1.0 / trace
    sigma_n = sigma * r_tr
    p = eye
    for _ in range(T):                                   # T is small & static
        p2 = jnp.einsum('gij,gjk->gik', p, p,
                        preferred_element_type=jnp.float32)
        p3 = jnp.einsum('gij,gjk->gik', p2, p,
                        preferred_element_type=jnp.float32)
        p = 1.5 * p - 0.5 * jnp.einsum('gij,gjk->gik', p3, sigma_n,
                                       preferred_element_type=jnp.float32)
    wm_ref[...] = p * jnp.sqrt(r_tr)


def _compute_whitening_matrix(sigma, T):
    g, d, _ = sigma.shape
    return pl.pallas_call(
        functools.partial(_newton_kernel, T=T),
        out_shape=jax.ShapeDtypeStruct((g, d, d), jnp.float32),
    )(sigma)


# ---------------------------------------------------------------------------
# Pass 3: whitening + fused affine epilogue
# ---------------------------------------------------------------------------
def _whiten_kernel(x_ref, wm_ref, mu_ref, w_ref, b_ref, o_ref, *, mxu_bf16):
    x = x_ref[0]                                         # (d, t), original dtype
    xc = x.astype(jnp.float32) - mu_ref[0]               # center in f32   (d, t)
    wm = wm_ref[0]                                       # (d, d) f32
    if mxu_bf16:
        xn = jnp.dot(wm.astype(jnp.bfloat16), xc.astype(jnp.bfloat16),
                     preferred_element_type=jnp.float32)
    else:
        xn = jnp.dot(wm, xc, preferred_element_type=jnp.float32)
    # fused affine epilogue (per-channel scale / shift)
    o_ref[0] = (xn * w_ref[...] + b_ref[...]).astype(o_ref.dtype)


def _apply_whitening(x3, wm, mean_col, w_col, b_col, g, d, mxu_bf16):
    """x3: (N, C, HW); wm: (g,d,d) f32; mean_col: (g,d,1); w/b: (C,1)."""
    N, C, HW = x3.shape
    t = _pick_hw_tile(HW)
    nt = HW // t
    kernel = functools.partial(_whiten_kernel, mxu_bf16=mxu_bf16)
    return pl.pallas_call(
        kernel,
        out_shape=jax.ShapeDtypeStruct((N, C, HW), x3.dtype),
        grid_spec=pltpu.PrefetchScalarGridSpec(
            num_scalar_prefetch=0,
            grid=(g, N, nt),
            in_specs=[pl.BlockSpec((1, d, t), lambda gi, n, ti: (n, gi, ti)),
                      pl.BlockSpec((1, d, d), lambda gi, n, ti: (gi, 0, 0)),
                      pl.BlockSpec((1, d, 1), lambda gi, n, ti: (gi, 0, 0)),
                      pl.BlockSpec((d, 1), lambda gi, n, ti: (gi, 0)),
                      pl.BlockSpec((d, 1), lambda gi, n, ti: (gi, 0))],
            out_specs=pl.BlockSpec((1, d, t), lambda gi, n, ti: (n, gi, ti))),
        compiler_params=pltpu.CompilerParams(
            dimension_semantics=("parallel", "parallel", "arbitrary"),
            vmem_limit_bytes=_VMEM_LIMIT),
    )(x3, wm, mean_col, w_col, b_col)


# ---------------------------------------------------------------------------
# Module wrapper (mirrors the PyTorch IterNorm forward)
# ---------------------------------------------------------------------------
class IterNorm:
    """JAX/Pallas port of the PyTorch IterNorm module (forward pass)."""

    def __init__(self, num_features, num_groups=1, num_channels=None, T=5,
                 dim=4, eps=1e-5, momentum=0.1, affine=True, mxu_bf16=True):
        self.T = T
        self.eps = eps
        self.momentum = momentum
        self.num_features = num_features
        self.affine = affine
        self.dim = dim
        self.mxu_bf16 = mxu_bf16
        if num_channels is None:
            num_channels = (num_features - 1) // num_groups + 1
        num_groups = num_features // num_channels
        while num_features % num_channels != 0:
            num_channels //= 2
            num_groups = num_features // num_channels
        assert num_groups > 0 and num_features % num_groups == 0
        self.num_groups = num_groups
        self.num_channels = num_channels

        shape = [1] * dim
        shape[1] = num_features
        if affine:
            # deterministic init, matching reset_parameters(): ones / zeros
            self.weight = jnp.ones(shape, jnp.float32)
            self.bias = jnp.zeros(shape, jnp.float32)
        else:
            self.weight = None
            self.bias = None
        self.running_mean = jnp.zeros((num_groups, num_channels, 1), jnp.float32)
        self.running_wm = jnp.tile(
            jnp.eye(num_channels, dtype=jnp.float32)[None], (num_groups, 1, 1))
        self.training = True

    def __call__(self, X):
        N, C = X.shape[0], X.shape[1]
        g, d = self.num_groups, self.num_channels
        assert d % 8 == 0 or g == 1, (
            "Pallas block over the channel axis needs num_channels % 8 == 0 "
            "(or a single group).")
        HW = 1
        for s in X.shape[2:]:
            HW *= s
        x3 = X.reshape(N, C, HW)        # free: collapses trailing dims only

        if self.affine:
            w_col = self.weight.reshape(C, 1).astype(jnp.float32)
            b_col = self.bias.reshape(C, 1).astype(jnp.float32)
        else:
            w_col = jnp.ones((C, 1), jnp.float32)
            b_col = jnp.zeros((C, 1), jnp.float32)

        if self.training:
            sigma, mean_row = _compute_group_stats(x3, g, d, self.eps,
                                                   self.mxu_bf16)
            wm = _compute_whitening_matrix(sigma, self.T)
            mean_col = jnp.transpose(mean_row, (0, 2, 1))     # (g, d, 1), tiny
            # running-buffer updates (in-place copy_ in the PyTorch module)
            self.running_mean = (self.momentum * mean_col
                                 + (1.0 - self.momentum) * self.running_mean)
            self.running_wm = (self.momentum * wm
                               + (1.0 - self.momentum) * self.running_wm)
        else:
            mean_col = self.running_mean
            wm = self.running_wm

        out3 = _apply_whitening(x3, wm, mean_col, w_col, b_col, g, d,
                                self.mxu_bf16)
        return out3.reshape(X.shape)


# ---------------------------------------------------------------------------
# Pure-JAX reference (transcription of the PyTorch training forward)
# ---------------------------------------------------------------------------
def _reference_forward(X, num_groups, num_channels, T, eps, weight, bias):
    N, C = X.shape[0], X.shape[1]
    g, d = num_groups, num_channels
    perm = (1, 0) + tuple(range(2, X.ndim))
    x = jnp.reshape(jnp.transpose(X, perm).astype(jnp.float32), (g, d, -1))
    m = x.shape[-1]
    mean = jnp.mean(x, axis=-1, keepdims=True)
    xc = x - mean
    eye = jnp.tile(jnp.eye(d, dtype=jnp.float32)[None], (g, 1, 1))
    sigma = eye * eps + jnp.einsum('gdm,gem->gde', xc, xc) / m
    r_tr = 1.0 / jnp.sum(sigma * eye, axis=(1, 2), keepdims=True)
    sigma_n = sigma * r_tr
    p = eye
    for _ in range(T):
        p3 = jnp.einsum('gij,gjk,gkl->gil', p, p, p)
        p = 1.5 * p - 0.5 * jnp.einsum('gij,gjk->gik', p3, sigma_n)
    wm = p * jnp.sqrt(r_tr)
    xn = jnp.einsum('gij,gjm->gim', wm, xc)
    Xn = jnp.transpose(jnp.reshape(xn, (C, N) + X.shape[2:]), perm)
    return Xn * weight + bias


if __name__ == "__main__":
    key = jax.random.PRNGKey(0)
    # small shapes: batch=2, features=16, spatial=8x8, num_groups=2 -> d=8, m=128
    N, C, H, W = 2, 16, 8, 8
    X = jax.random.normal(key, (N, C, H, W), dtype=jnp.float32)

    weight = jnp.ones((1, C, 1, 1), jnp.float32)
    bias = jnp.zeros((1, C, 1, 1), jnp.float32)
    ref = jax.block_until_ready(_reference_forward(X, 2, 8, 5, 1e-5, weight, bias))

    # --- training forward, f32 MXU operands ---
    model_f32 = IterNorm(num_features=C, num_groups=2, T=5, dim=4, eps=1e-5,
                         momentum=0.1, affine=True, mxu_bf16=False)
    out_f32 = jax.block_until_ready(model_f32(X))
    assert out_f32.shape == X.shape
    err = float(jnp.max(jnp.abs(out_f32 - ref)))
    assert jnp.allclose(out_f32, ref, atol=5e-2, rtol=5e-2), \
        f"f32 path max abs diff {err}"

    # --- training forward, bf16 MXU operands (default fast path) ---
    model_bf16 = IterNorm(num_features=C, num_groups=2, T=5, dim=4, eps=1e-5,
                          momentum=0.1, affine=True, mxu_bf16=True)
    out_bf16 = jax.block_until_ready(model_bf16(X))
    err = float(jnp.max(jnp.abs(out_bf16 - ref)))
    assert jnp.allclose(out_bf16, ref, atol=1e-1, rtol=1e-1), \
        f"bf16 path max abs diff {err}"

    # --- eval forward (running stats: mean=0, wm=I) reuses the whitening kernel ---
    model_eval = IterNorm(num_features=C, num_groups=2, T=5, dim=4, eps=1e-5,
                          momentum=0.1, affine=True, mxu_bf16=True)
    model_eval.training = False
    out_eval = jax.block_until_ready(model_eval(X))
    err = float(jnp.max(jnp.abs(out_eval - X)))
    assert jnp.allclose(out_eval, X, atol=3e-2, rtol=3e-2), \
        f"eval path max abs diff {err}"

    print("KERNEL_OK")
</pallas_src>

<mosaic_0001>
module attributes {stable_mosaic.version = 11 : i64} {
  func.func @_stats_kernel(%arg0: i32, %arg1: i32, %arg2: i32, %arg3: memref<1x8x64xf32, #tpu.memory_space<vmem>>, %arg4: memref<1x8x8xf32, #tpu.memory_space<vmem>>, %arg5: memref<1x1x8xf32, #tpu.memory_space<vmem>>, %arg6: memref<8x8xf32, #tpu.memory_space<vmem>>, %arg7: memref<8x1xf32, #tpu.memory_space<vmem>>) attributes {dimension_semantics = [#tpu.dimension_semantics<parallel>, #tpu.dimension_semantics<arbitrary>, #tpu.dimension_semantics<arbitrary>], iteration_bounds = array<i64: 2, 2, 1>, scalar_prefetch = 0 : i64, scratch_operands = 2 : i64, tpu.core_type = #tpu.core_type<tc>, window_params = [{transform_indices = @transform_0, window_bounds = array<i64: 1, 8, 64>}, {transform_indices = @transform_1, window_bounds = array<i64: 1, 8, 8>}, {transform_indices = @transform_2, window_bounds = array<i64: 1, 1, 8>}]} {
    %c0_i32 = arith.constant 0 : i32
    %0 = arith.cmpi eq, %arg1, %c0_i32 : i32
    %c0_i32_0 = arith.constant 0 : i32
    %1 = arith.cmpi eq, %arg2, %c0_i32_0 : i32
    %2 = arith.andi %0, %1 : i1
    %c1_i32 = arith.constant 1 : i32
    %3 = arith.cmpi eq, %arg1, %c1_i32 : i32
    %c0_i32_1 = arith.constant 0 : i32
    %4 = arith.cmpi eq, %arg2, %c0_i32_1 : i32
    %5 = arith.andi %3, %4 : i1
    %6 = arith.extui %2 : i1 to i32
    %c0_i32_2 = arith.constant 0 : i32
    %7 = arith.cmpi ne, %6, %c0_i32_2 : i32
    scf.if %7 {
      %cst_15 = arith.constant 0.000000e+00 : f32
      %21 = vector.broadcast %cst_15 : f32 to vector<8x8xf32>
      %c0_16 = arith.constant 0 : index
      %c0_17 = arith.constant 0 : index
      %22 = vector.load %arg6[%c0_16, %c0_17] : memref<8x8xf32, #tpu.memory_space<vmem>>, vector<8x8xf32>
      tpu.vector_store %arg6[%c0_16, %c0_17], %21 {strides = array<i32>} : memref<8x8xf32, #tpu.memory_space<vmem>>, vector<8x8xf32>,
      %cst_18 = arith.constant 0.000000e+00 : f32
      %23 = vector.broadcast %cst_18 : f32 to vector<8x1xf32>
      %c0_19 = arith.constant 0 : index
      %c0_20 = arith.constant 0 : index
      %24 = vector.load %arg7[%c0_19, %c0_20] : memref<8x1xf32, #tpu.memory_space<vmem>>, vector<8x1xf32>
      tpu.vector_store %arg7[%c0_19, %c0_20], %23 {strides = array<i32>} : memref<8x1xf32, #tpu.memory_space<vmem>>, vector<8x1xf32>,
    } else {
    }
    %c0 = arith.constant 0 : index
    %c0_3 = arith.constant 0 : index
    %c0_4 = arith.constant 0 : index
    %8 = vector.load %arg3[%c0, %c0_3, %c0_4] : memref<1x8x64xf32, #tpu.memory_space<vmem>>, vector<1x8x64xf32>
    %9 = vector.shape_cast %8 : vector<1x8x64xf32> to vector<8x64xf32>
    %c0_5 = arith.constant 0 : index
    %c0_6 = arith.constant 0 : index
    %10 = vector.load %arg7[%c0_5, %c0_6] : memref<8x1xf32, #tpu.memory_space<vmem>>, vector<8x1xf32>
    %cst = arith.constant dense<0.000000e+00> : vector<8xf32>
    %11 = vector.multi_reduction <add>, %9, %cst [1] : vector<8x64xf32> to vector<8xf32>
    %12 = vector.shape_cast %11 : vector<8xf32> to vector<8x1xf32>
    %13 = arith.addf %10, %12 : vector<8x1xf32>
    %c0_7 = arith.constant 0 : index
    %c0_8 = arith.constant 0 : index
    %14 = vector.load %arg7[%c0_7, %c0_8] : memref<8x1xf32, #tpu.memory_space<vmem>>, vector<8x1xf32>
    tpu.vector_store %arg7[%c0_7, %c0_8], %13 {strides = array<i32>} : memref<8x1xf32, #tpu.memory_space<vmem>>, vector<8x1xf32>,
    %c0_9 = arith.constant 0 : index
    %c0_10 = arith.constant 0 : index
    %15 = vector.load %arg6[%c0_9, %c0_10] : memref<8x8xf32, #tpu.memory_space<vmem>>, vector<8x8xf32>
    %cst_11 = arith.constant dense<0.000000e+00> : vector<8x8xf32>
    %16 = tpu.matmul %9, %9, %cst_11 {dimension_numbers = #tpu.dot_dimension_numbers<[1], [1], [0], [0], [0, 0, 1, 0], [], []>} : vector<8x64xf32>, vector<8x64xf32>, vector<8x8xf32> -> vector<8x8xf32>
    %17 = arith.addf %15, %16 : vector<8x8xf32>
    %c0_12 = arith.constant 0 : index
    %c0_13 = arith.constant 0 : index
    %18 = vector.load %arg6[%c0_12, %c0_13] : memref<8x8xf32, #tpu.memory_space<vmem>>, vector<8x8xf32>
    tpu.vector_store %arg6[%c0_12, %c0_13], %17 {strides = array<i32>} : memref<8x8xf32, #tpu.memory_space<vmem>>, vector<8x8xf32>,
    %19 = arith.extui %5 : i1 to i32
    %c0_i32_14 = arith.constant 0 : i32
    %20 = arith.cmpi ne, %19, %c0_i32_14 : i32
    scf.if %20 {
      %21 = tpu.iota {dimensions = array<i32: 0>} : vector<8x8xi32>
      %22 = tpu.iota {dimensions = array<i32: 1>} : vector<8x8xi32>
      %23 = arith.cmpi eq, %21, %22 : vector<8x8xi32>
      %24 = arith.extui %23 : vector<8x8xi1> to vector<8x8xi32>
      %25 = arith.sitofp %24 : vector<8x8xi32> to vector<8x8xf32>
      %c0_15 = arith.constant 0 : index
      %c0_16 = arith.constant 0 : index
      %26 = vector.load %arg7[%c0_15, %c0_16] : memref<8x1xf32, #tpu.memory_space<vmem>>, vector<8x1xf32>
      %cst_17 = arith.constant 7.812500e-03 : f32
      %27 = vector.broadcast %cst_17 : f32 to vector<8x1xf32>
      %28 = arith.mulf %26, %27 : vector<8x1xf32>
      %29 = vector.broadcast %28 : vector<8x1xf32> to vector<8x8xf32>
      %30 = arith.mulf %25, %29 : vector<8x8xf32>
      %cst_18 = arith.constant dense<0.000000e+00> : vector<8xf32>
      %31 = vector.multi_reduction <add>, %30, %cst_18 [0] : vector<8x8xf32> to vector<8xf32>
      %32 = vector.shape_cast %31 : vector<8xf32> to vector<1x8xf32>
      %c0_19 = arith.constant 0 : index
      %c0_20 = arith.constant 0 : index
      %33 = vector.load %arg6[%c0_19, %c0_20] : memref<8x8xf32, #tpu.memory_space<vmem>>, vector<8x8xf32>
      %cst_21 = arith.constant 7.812500e-03 : f32
      %34 = vector.broadcast %cst_21 : f32 to vector<8x8xf32>
      %35 = arith.mulf %33, %34 : vector<8x8xf32>
      %36 = vector.broadcast %28 : vector<8x1xf32> to vector<8x8xf32>
      %37 = vector.broadcast %32 : vector<1x8xf32> to vector<8x8xf32>
      %38 = arith.mulf %36, %37 : vector<8x8xf32>
      %39 = arith.subf %35, %38 : vector<8x8xf32>
      %cst_22 = arith.constant 9.99999974E-6 : f32
      %40 = vector.broadcast %cst_22 : f32 to vector<8x8xf32>
      %41 = arith.mulf %40, %25 : vector<8x8xf32>
      %42 = arith.addf %39, %41 : vector<8x8xf32>
      %c0_23 = arith.constant 0 : index
      %c0_24 = arith.constant 0 : index
      %c0_25 = arith.constant 0 : index
      %43 = vector.load %arg4[%c0_23, %c0_24, %c0_25] : memref<1x8x8xf32, #tpu.memory_space<vmem>>, vector<1x8x8xf32>
      %44 = vector.shape_cast %43 : vector<1x8x8xf32> to vector<8x8xf32>
      %45 = vector.shape_cast %42 : vector<8x8xf32> to vector<1x8x8xf32>
      tpu.vector_store %arg4[%c0_23, %c0_24, %c0_25], %45 {strides = array<i32>} : memref<1x8x8xf32, #tpu.memory_space<vmem>>, vector<1x8x8xf32>,
      %c0_26 = arith.constant 0 : index
      %c0_27 = arith.constant 0 : index
      %c0_28 = arith.constant 0 : index
      %46 = vector.load %arg5[%c0_26, %c0_27, %c0_28] : memref<1x1x8xf32, #tpu.memory_space<vmem>>, vector<1x1x8xf32>
      %47 = vector.shape_cast %46 : vector<1x1x8xf32> to vector<1x8xf32>
      %48 = vector.shape_cast %32 : vector<1x8xf32> to vector<1x1x8xf32>
      tpu.vector_store %arg5[%c0_26, %c0_27, %c0_28], %48 {strides = array<i32>} : memref<1x1x8xf32, #tpu.memory_space<vmem>>, vector<1x1x8xf32>,
    } else {
    }
    return
  }
  func.func @transform_0(%arg0: i32, %arg1: i32, %arg2: i32) -> (i32, i32, i32) {
    %c0_i32 = arith.constant 0 : i32
    return %arg1, %arg0, %arg2 : i32, i32, i32
  }
  func.func @transform_1(%arg0: i32, %arg1: i32, %arg2: i32) -> (i32, i32, i32) {
    %c0_i32 = arith.constant 0 : i32
    %c0_i32_0 = arith.constant 0 : i32
    %c0_i32_1 = arith.constant 0 : i32
    return %arg0, %c0_i32, %c0_i32_0 : i32, i32, i32
  }
  func.func @transform_2(%arg0: i32, %arg1: i32, %arg2: i32) -> (i32, i32, i32) {
    %c0_i32 = arith.constant 0 : i32
    %c0_i32_0 = arith.constant 0 : i32
    %c0_i32_1 = arith.constant 0 : i32
    return %arg0, %c0_i32, %c0_i32_0 : i32, i32, i32
  }
}

</mosaic_0001>

<bundles_post_ra>
// kernel: tpu_custom_call.1
= control target key start
LH: loop header
LB: loop body
LE: loop exit
PB: predicated region body
PF: predicated region fallthrough
CT: control target
= control target key end

     0   :  { %8 = vsyncpa [#allocation5], 0  ;;  %s1035_s0 = inlined_call_operand.hbm [shape: f32[2,16,64], index: 0, kind: input, shape index: {}]   ;;  %s1036_s1 = inlined_call_operand.hbm [shape: f32[2,8,8], index: 1, kind: output, shape index: {0}]   ;;  %s1037_s2 = inlined_call_operand.hbm [shape: f32[2,1,8], index: 2, kind: output, shape index: {1}]  }
   0x1   :  { %10 = vsyncpa [#allocation5 + $0x1], 0 }
   0x2   :  { %11 = vsyncpa [#allocation6], 0 }
   0x3   :  { %13 = vsyncpa [#allocation6 + $0x1], 0 }
   0x4   :  { %14 = vsyncpa [#allocation9], 0 }
   0x5   :  { %16 = vsyncpa [#allocation9 + $0x1], 0  ;;  %s818_s9 = smov 0   ;;  %s820_s10 = smov 0  }
   0x6   :  { %s822_s11 = smov 0   ;;  %s824_s12 = smov 0  }
   0x7   :  { %s826_s13 = smov 0   ;;  %s828_s14 = smov 0  }
   0x8   :  { %s830_s15 = smov 0   ;;  %s832_s16 = smov 0  }
   0x9   :  { %s834_s17 = smov 0   ;;  %s836_s18 = smov 0  }
   0xa   :  { %s838_s19 = smov 0  }
   0xb LB: > { %s473_s20 = sadd.s32 4294967295, %s793_s19   ;;  %s474_s21 = sadd.s32 4294967294, %s793_s19   ;;  %s793_s19 = sphi %s838_s19, %s22_s19   ;;  %s789_s18 = sphi %s836_s18, %s1059_s18   ;;  %s785_s17 = sphi %s834_s17, %s1058_s17   ;;  %s781_s16 = sphi %s832_s16, %s1057_s16   ;;  %s777_s15 = sphi %s830_s15, %s1056_s15   ;;  %s773_s14 = sphi %s828_s14, %s1055_s14   ;;  %s769_s13 = sphi %s826_s13, %s1054_s13   ;;  %s765_s12 = sphi %s824_s12, %s1053_s12   ;;  %s761_s11 = sphi %s822_s11, %s1052_s11   ;;  %s757_s10 = sphi %s820_s10, %s1051_s10   ;;  %s753_s9 = sphi %s818_s9, %s1050_s9  }
   0xc   : > { %s37_s22 = sadd.s32 1, %s785_s17  ;;  %s41_s23 = sadd.s32 1, %s789_s18 }
   0xd   : > { %p39_p0 = scmp.ge.s32.totalorder %s37_s22, 2  ;;  %s52_s24 = sadd.s32 1, %s773_s14 }
   0xe   : > { %p59_p1 = scmp.ne.s32.totalorder %s773_s14, %s769_s13  ;;  %p60_p2 = scmp.eq.s32.totalorder %s793_s19, 0 }
   0xf   : > { %s1061_s22 = smov (%p39_p0, %s37_s22), 0  ;;  %s1063_s23 = smov (!%p39_p0, %s41_s23), %s789_s18 }
  0x10   : > { %1040 = sst [smem:[#allocation13_spill]] %s1061_s22  ;;  %s45_s25 = ssub.s32 %s785_s17, %s1061_s22 }
  0x11   : > { %p884_p3 = por %p60_p2, %p59_p1  ;;  %p43_p4 = scmp.ge.s32.totalorder %s1063_s23, 2 }
  0x12   : > { %p65_p5 = scmp.ne.s32.totalorder %s769_s13, %s765_s12  ;;  %p66_p6 = scmp.eq.s32.totalorder %s473_s20, 0 }
  0x13   : > { %s78_s27 = sadd.s32 1, %s761_s11  ;;  %s1065_s23 = smov (%p43_p4, %s1063_s23), 0 }
  0x14   : > { %1042 = sst [smem:[#allocation14_spill]] %s1065_s23  ;;  %p892_p7 = por %p66_p6, %p65_p5 }
  0x15   : > { %p88_p8 = scmp.ne.s32.totalorder %s761_s11, %s757_s10  ;;  %s46_s29 = ssub.s32 %s789_s18, %s1065_s23 }
  0x16   : > { %p89_p9 = scmp.eq.s32.totalorder %s473_s20, 3  ;;  %s47_s30 = sor.u32 %s46_s29, %s45_s25 }
  0x17   : > { %p76_p10 = scmp.eq.s32.totalorder %s46_s29, 0  ;;  %p50_p11 = scmp.eq.s32.totalorder %s47_s30, 0 }
  0x18   : > { %p900_p12 = por %p89_p9, %p88_p8  ;;  %p94_p13 = scmp.ne.s32.totalorder %s757_s10, %s753_s9 }
  0x19   : > { %s905_s4 = scalar_select %p76_p10, %s761_s11, %s78_s27  }
  0x1a   : > { %s908_s5 = scalar_select %p50_p11, %s773_s14, %s52_s24  }
  0x1b   : > { %p95_p0 = scmp.eq.s32.totalorder %s474_s21, 3  ;;  %p519_p1 = scmp.lt.s32.totalorder %s793_s19, 4 }
  0x1c   : > { %s141_s7 = sand.u32 1, %s773_s14   ;;  %s478_s12 = sshll.u32 %s785_s17, 1 }
  0x1d   : > { %p913_p2 = por %p95_p0, %p94_p13  ;;  %s477_s8 = sshll.u32 %s141_s7, 3 }
  0x1e   : > { %s151_s20 = sadd.s32 %s789_s18, %s478_s12  ;;  %s145_s25 = scalar_lea.vmem [#allocation4], %s477_s8 }
  0x1f   : > { %s1045_s6 = scalar_select %p913_p2, 1, 0 }
  0x20   : > { %s155_s29 = sshll.u32 %s145_s25, 4  ;;  %s479_s30 = sshll.u32 %s151_s20, 7  ;;  %s156_s29 = int_to_ptr.vmem [resolvable:$true] %s155_s29 }
  0x21   : > { %s153_s24 = scalar_lea.hbm %s1035_s0, %s479_s30  ;;  %p925_p4 = pnand %p519_p1, %p884_p3 }
  0x22   : > { %p480_p5 = scmp.ge.s32.totalorder %s793_s19, 1  ;;  %p160_p6 = scmp.lt.s32.totalorder %s793_s19, 5 }
  0x23   : > { %s142_s22 = scalar_lea.sflag [#allocation5], %s141_s7  ;;  %p617_p8 = pneg %p925_p4 }
  0x24   : > { %s628_s12 = scalar_lea.vmem %s156_s29, 128  ;;  %s795_s8 = smov [#allocation4]  }
  0x25   : > { %p629_p9 = scmp.ne.s32.totalorder %s156_s29, %s628_s12  ;;  %s633_s20 = sshll.u32 %s795_s8, 4  ;;  %s634_s20 = int_to_ptr.vmem [resolvable:$false] %s633_s20 }
  0x26   : > { %s635_s23 = scalar_lea.vmem %s634_s20, 256  ;;  %p636_p13 = scmp.lt.s32.totalorder %s156_s29, %s634_s20 }
  0x27   : > { %p631_p10 = pnand %p629_p9, %p617_p8  ;;  %p637_p0 = scmp.lt.s32.totalorder %s635_s23, %s628_s12 }
  0x29   : > { %p632_p11 = pneg %p631_p10  ;;  %p638_p3 = por %p637_p0, %p636_p13 }
  0x2b   : > { %p639_p1 = pnand %p638_p3, %p632_p11 }
  0x2d   : > { %642 = shalt.err (!%p639_p1)
}
  0x2e   : > { %511 = dma.hbm_to_vmem [thread:$0]  (!%p925_p4), %s153_s24, 128, %s156_s29, %s142_s22  }
  0x2f   : > { %p161_p2 = pnand %p480_p5, %p160_p6 }
  0x30   : > { %s166_s26 = sand.u32 (!%p161_p2), 1, %s769_s13  }
  0x31   : > { %164 = sbr.rel (%p161_p2) target bundleno = 407 (0x197), region = 24  ;;  %s481_s7 = sshll.u32 (!%p161_p2), %s166_s26, 3 }
  0x32   : > { %s167_s25 = scalar_lea.sflag (!%p161_p2), [#allocation5], %s166_s26  ;;  %s170_s30 = scalar_lea.vmem (!%p161_p2), [#allocation4], %s481_s7 }
  0x36   : > { %740 = dma.done.wait (%p892_p7), %s167_s25, 128  }
  0x37   : > { %742 = vsyncadd (%p892_p7), %s167_s25, 4294967168  ;;  %s945_s27 = sand.u32 1, %s757_s10   ;;  %p195_p4 = scmp.eq.s32.totalorder %s777_s15, 0 }
  0x38   : > { %s482_s22 = sshll.u32 %s945_s27, 3  ;;  %p199_p2 = scmp.eq.s32.totalorder %s777_s15, 1  ;;  %vm204_vm0 = vcmask (%p195_p4), 64512   ;;  %vm206_vm1 = vcmask (%p195_p4), 7168   ;;  %v796_v0 = vmov (%p195_p4), 0.0  }
  0x39   : > { %s950_s29 = scalar_lea.vmem [#allocation7], %s482_s22  ;;  %s194_s24 = scalar_lea.vmem [#allocation8], %s945_s27  ;;  %205 = vst.msk [vmem:[#allocation2] sm:$0xff] (%p195_p4), %vm204_vm0, %v796_v0 }
  0x3a   : > { %203 = sbr.rel (!%p195_p4) target bundleno = 63 (0x3f), region = 32  ;;  %207 = vst.msk [vmem:[#allocation3] sm:$0xff] (%p195_p4), %vm206_vm1, %v796_v0 }
  0x3f PF: > { %v208_v1 = vld [vmem:[%s170_s30] sm:$0xff]  ;;  %vm210_vm2 = vcmask 523264   ;;  %v797_v2 = vmov 0.0   ;;  %vm798_vm3 = vmmov 0   ;;  %vm215_vm4 = vcmask 7168  }
  0x40   : > { %497 = vmatprep.subr.mxu0 %v797_v2  ;;  %499 = vmatprep.mubr.msk.f32.mxu0 %vm798_vm3, %v797_v2  ;;  %v211_v3 = vsel %vm210_vm2, %v208_v1, 0.0  ;;  %v217_v7 = vld [vmem:[#allocation2] sm:$0xff]  ;;  %vm292_vm5 = vcmask 64512   ;;  %v799_v12 = vmov (%p199_p2), 0   ;;  %v296_v14 = vlaneseq (%p199_p2) }
  0x41   : > { %498 = vmatpush3.xpose.msk.msra.mxu0 %vm210_vm2, %v208_v1  ;;  %212 = vadd.xlane.f32.xlu0 %v211_v3  ;;  %v209_v4 = vld [vmem:[#allocation3] sm:$0xff]  ;;  %v800_v17 = vmov (%p199_p2), 0.0   ;;  %vm325_vm7 = vcmask (%p199_p2), 57344  }
  0x42   : > { %614 = vset.pattern.permute.xlu0 (%p199_p2), %v799_v12  ;;  %v297_v15 = vshrl.u32 (%p199_p2), %v296_v14, 7  ;;  %v299_v16 = vand.u32 (%p199_p2), 127, %v296_v14 }
  0x44   : > { %500 = vmatmul.mubr.msk.f32.vlgmr.msra.gmra.mxu0 %vm210_vm2, %v208_v1  ;;  %vm300_vm6 = vcmp.eq.s32.totalorder (%p199_p2), %v297_v15, %v299_v16 }
  0x45   : > { %v487_v18 = vsel (%p199_p2), %vm300_vm6, 1.0, %v800_v17 }
  0x46   : > { %v322_v31 = vmul.f32 (%p199_p2), 1e-05, %v487_v18 }
  0xca   : > { %v213_v5 = vpop.xlane.xlu0 %212 }
  0xcb   : > { %v214_v6 = vadd.f32 %v213_v5, %v209_v4 }
  0xcd   : > { %216 = vst.msk [vmem:[#allocation3] sm:$0xff] %vm215_vm4, %v214_v6 }
  0xd4   : > { %v303_v11 = vld [vmem:[#allocation3] sm:$0xff] (%p199_p2) }
  0xd5   : > { %v304_v13 = vmul.f32 (%p199_p2), 0.0078125, %v303_v11 }
  0xd7   : > { %307 = vperm.xlu0 (%p199_p2), %614, %v304_v13  }
 0x103   : > { %295 = sbr.rel (!%p199_p2) target bundleno = 361 (0x169), region = 36 }
 0x104   : > { %v287_v8 = vpop.f32.mrf.mxu0 }
 0x105   : > { %v291_v9 = vadd.f32 %v287_v8, %v217_v7 }
 0x106   : > { %v501_v10 = vpop.f32.mrf.mxu0 }
 0x107   : > { %293 = vst.msk [vmem:[#allocation2] sm:$0xff] %vm292_vm5, %v291_v9 }
 0x10e   : > { %v318_v26 = vld [vmem:[#allocation2] sm:$0xff] }
 0x10f   : > { %v319_v28 = vmul.f32 0.0078125, %v318_v26 }
 0x152   : > { %v308_v19 = vpop.permute.xlu0 %307 }
 0x153   : > { %v310_v20 = vmul.f32 %v487_v18, %v308_v19 }
 0x155   : > { %v311_v21 = vsel %vm292_vm5, %v310_v20, 0.0 }
 0x156   : > { %v312_v22 = vrot.slane %v311_v21, 4 }
 0x158   : > { %v313_v23 = vadd.f32 %v312_v22, %v311_v21 }
 0x15a   : > { %v314_v24 = vrot.slane %v313_v23, 2 }
 0x15c   : > { %v315_v25 = vadd.f32 %v314_v24, %v313_v23 }
 0x15e   : > { %v316_v27 = vrot.slane %v315_v25, 1 }
 0x160   : > { %v317_v29 = vadd.f32 %v316_v27, %v315_v25 }
 0x162   : > { %v320_v30 = vmul.f32 %v317_v29, %v308_v19  ;;  %326 = vst.msk [vmem:[%s194_s24] sm:$0x1] %vm325_vm7, %v317_v29 }
 0x164   : > { %v321_v32 = vsub.f32 %v319_v28, %v320_v30 }
 0x166   : > { %v323_v33 = vadd.f32 %v322_v31, %v321_v32 }
 0x168   : > { %324 = vst.msk [vmem:[%s950_s29] sm:$0xff] %vm292_vm5, %v323_v33 }
 0x169 PF: > { %s489_s15 = sshll.u32 %s781_s16, 7  ;;  %s345_s8 = sshll.u32 %s950_s29, 4  ;;  %s346_s8 = int_to_ptr.vmem [resolvable:$true] %s345_s8 }
 0x16a   : > { %s343_s12 = scalar_lea.hbm %s1036_s1, %s489_s15  ;;  %s328_s20 = scalar_lea.sflag [#allocation6], %s945_s27 }
 0x16b   : > { %s643_s23 = scalar_lea.vmem %s346_s8, 128  ;;  %s801_s26 = smov [#allocation7]  }
 0x16c   : > { %p644_p7 = scmp.ne.s32.totalorder %s346_s8, %s643_s23  ;;  %s647_s7 = sshll.u32 %s801_s26, 4  ;;  %s648_s7 = int_to_ptr.vmem [resolvable:$false] %s647_s7 }
 0x16d   : > { %s649_s25 = scalar_lea.vmem %s648_s7, 256  ;;  %p650_p8 = scmp.lt.s32.totalorder %s346_s8, %s648_s7 }
 0x16e   : > { %p645_p5 = pnand %p644_p7, %p900_p12  ;;  %p651_p9 = scmp.lt.s32.totalorder %s649_s25, %s643_s23 }
 0x170   : > { %p646_p6 = pneg %p645_p5  ;;  %p652_p10 = por %p651_p9, %p650_p8 }
 0x172   : > { %p653_p11 = pnand %p652_p10, %p646_p6 }
 0x174   : > { %656 = shalt.err (!%p653_p11)
}
 0x175   : > { %s657_s30 = scalar_lea.hbm %s343_s12, 128  ;;  %s661_s15 = scalar_lea.hbm %s1036_s1, 256 }
 0x176   : > { %p658_p13 = scmp.ne.s32.totalorder %s343_s12, %s657_s30  ;;  %p662_p1 = scmp.lt.s32.totalorder %s343_s12, %s1036_s1 }
 0x177   : > { %p663_p4 = scmp.lt.s32.totalorder %s661_s15, %s657_s30 }
 0x178   : > { %p659_p0 = pnand %p658_p13, %p900_p12 }
 0x179   : > { %p664_p2 = por %p663_p4, %p662_p1 }
 0x17a   : > { %p660_p3 = pneg %p659_p0 }
 0x17c   : > { %p665_p7 = pnand %p664_p2, %p660_p3 }
 0x17e   : > { %668 = shalt.err (!%p665_p7)
}
 0x17f   : > { %504 = dma.vmem_to_hbm [thread:$0]  (%p900_p12), %s346_s8, 128, %s343_s12, %s328_s20  }
 0x180   : > { %s490_s23 = sshll.u32 %s781_s16, 4  ;;  %s358_s26 = sshll.u32 %s194_s24, 4  ;;  %s359_s26 = int_to_ptr.vmem [resolvable:$true] %s358_s26 }
 0x181   : > { %s356_s22 = scalar_lea.hbm %s1037_s2, %s490_s23  ;;  %s333_s29 = scalar_lea.sflag [#allocation9], %s945_s27 }
 0x182   : > { %s669_s30 = scalar_lea.vmem %s359_s26, 16  ;;  %s802_s15 = smov [#allocation8]  }
 0x183   : > { %p670_p5 = scmp.ne.s32.totalorder %s359_s26, %s669_s30  ;;  %s673_s28 = sshll.u32 %s802_s15, 4  ;;  %s674_s28 = int_to_ptr.vmem [resolvable:$false] %s673_s28 }
 0x184   : > { %s675_s21 = scalar_lea.vmem %s674_s28, 32  ;;  %p676_p9 = scmp.lt.s32.totalorder %s359_s26, %s674_s28 }
 0x185   : > { %p671_p6 = pnand %p670_p5, %p900_p12  ;;  %p677_p10 = scmp.lt.s32.totalorder %s675_s21, %s669_s30 }
 0x187   : > { %p672_p8 = pneg %p671_p6  ;;  %p678_p11 = por %p677_p10, %p676_p9 }
 0x189   : > { %p679_p13 = pnand %p678_p11, %p672_p8 }
 0x18b   : > { %682 = shalt.err (!%p679_p13)
}
 0x18c   : > { %s683_s16 = scalar_lea.hbm %s356_s22, 16  ;;  %s687_s12 = scalar_lea.hbm %s1037_s2, 32 }
 0x18d   : > { %p684_p0 = scmp.ne.s32.totalorder %s356_s22, %s683_s16  ;;  %p688_p4 = scmp.lt.s32.totalorder %s356_s22, %s1037_s2 }
 0x18e   : > { %p689_p2 = scmp.lt.s32.totalorder %s687_s12, %s683_s16 }
 0x18f   : > { %p685_p3 = pnand %p684_p0, %p900_p12 }
 0x190   : > { %p690_p7 = por %p689_p2, %p688_p4 }
 0x191   : > { %p686_p1 = pneg %p685_p3 }
 0x193   : > { %p691_p5 = pnand %p690_p7, %p686_p1 }
 0x195   : > { %694 = shalt.err (!%p691_p5)
}
 0x196   : > { %505 = dma.vmem_to_hbm [thread:$0]  (%p900_p12), %s359_s26, 16, %s356_s22, %s333_s29  }
 0x197 PF: > { %p520_p6 = scmp.ge.s32.totalorder %s793_s19, 2  ;;  %s370_s23 = sand.u32 1, %s753_s9  }
 0x198   : > { %p1047_p8 = scmp.ne.s32.totalorder %s1045_s6, 0  ;;  %s371_s7 = scalar_lea.sflag [#allocation6], %s370_s23 }
 0x19a   : > { %p513_p9 = pnand %p520_p6, %p1047_p8 }
 0x19c   : > { %p514_p10 = pneg %p513_p9 }
 0x19e   : > { %744 = dma.done.wait (%p514_p10), %s371_s7, 128  }
 0x19f   : > { %746 = vsyncadd (%p514_p10), %s371_s7, 4294967168  ;;  %s380_s25 = scalar_lea.sflag [#allocation9], %s370_s23 }
 0x1a0   : > { %748 = dma.done.wait (%p514_p10), %s380_s25, 16  }
 0x1a1   : > { %750 = vsyncadd (%p514_p10), %s380_s25, 4294967280  ;;  %s22_s19 = sadd.s32 1, %s793_s19   ;;  %s1048_s3 = sld [smem:[#allocation13_spill]] }
 0x1a2   : > { %p19_p11 = scmp.ge.s32.totalorder %s22_s19, 6   ;;  %s1049_s6 = sld [smem:[#allocation14_spill]] }
 0x1a3   : > { %s1050_s9 = smov %s757_s10  ;;  %s1051_s10 = smov %s761_s11 }
 0x1a4   : > { %s1052_s11 = smov %s905_s4  ;;  %s1053_s12 = smov %s769_s13 }
 0x1a5   : > { %s1054_s13 = smov %s773_s14  ;;  %s1055_s14 = smov %s908_s5 }
 0x1a6   : > { %s1056_s15 = smov %s785_s17  ;;  %s1057_s16 = smov %s789_s18 }
 0x1a7   : > { %s1058_s17 = smov %s1048_s3  ;;  %21 = sbr.rel (!%p19_p11) target bundleno = 11 (0xb), region = 94 }
 0x1a8   : > { %s1059_s18 = smov %s1049_s6 }
 0x1ac   :  { %384 = vsyncpa [#allocation5], 1 }
 0x1ad   :  { %386 = vsyncpa [#allocation5 + $0x1], 1 }
 0x1ae   :  { %387 = vsyncpa [#allocation6], 1 }
 0x1af   :  { %389 = vsyncpa [#allocation6 + $0x1], 1 }
 0x1b0   :  { %390 = vsyncpa [#allocation9], 1 }
 0x1b1   :  { %392 = vsyncpa [#allocation9 + $0x1], 1 }

</bundles_post_ra>
